<compile_context>
chip_gen: v7x
topology: tpu7x:2x2x1
jax: 0.10.0
libtpu: 0.0.40
codegen_flags: <defaults>
</compile_context>

<pallas_src>
import functools
import math

import jax
import jax.numpy as jnp
import numpy as np
from jax.experimental import pallas as pl
from jax.experimental.pallas import tpu as pltpu


_DEFAULT_VMEM_LIMIT = 32 * 1024 * 1024


@functools.lru_cache(maxsize=1)
def _vmem_limit():
    """Half of physical VMEM, clamped to [32 MiB, 64 MiB] (v5e/v6e -> 64 MiB, v7x -> 32 MiB)."""
    try:
        cap = int(pltpu.get_tpu_info().vmem_capacity_bytes)
        return max(32 * 1024 * 1024, min(64 * 1024 * 1024, cap // 2))
    except Exception:
        return _DEFAULT_VMEM_LIMIT


def _pick_tile(dim, target, align=1):
    """Largest divisor of `dim` that is <= target and a multiple of `align`.
    Falls back to the full dim only if no such divisor exists."""
    dim = int(dim)
    target = int(target)
    if dim <= target:
        return dim
    for t in range(min(target, dim), 0, -1):
        if dim % t == 0 and t % align == 0:
            return t
    return dim


# --------------------------- tiled linear (matmul + optional bias) ---------------------------


def _matmul_kernel_1k(x_ref, w_ref, o_ref):
    o_ref[...] = jnp.dot(x_ref[...], w_ref[...],
                         preferred_element_type=jnp.float32).astype(o_ref.dtype)


def _matmul_bias_kernel_1k(x_ref, w_ref, b_ref, o_ref):
    acc = jnp.dot(x_ref[...], w_ref[...], preferred_element_type=jnp.float32)
    o_ref[...] = (acc + b_ref[...].astype(jnp.float32)).astype(o_ref.dtype)


def _matmul_kernel(x_ref, w_ref, o_ref, acc_ref):
    @pl.when(pl.program_id(2) == 0)
    def _init():
        acc_ref[...] = jnp.zeros_like(acc_ref)

    acc_ref[...] += jnp.dot(x_ref[...], w_ref[...],
                            preferred_element_type=jnp.float32)

    @pl.when(pl.program_id(2) == pl.num_programs(2) - 1)
    def _done():
        o_ref[...] = acc_ref[...].astype(o_ref.dtype)


def _matmul_bias_kernel(x_ref, w_ref, b_ref, o_ref, acc_ref):
    @pl.when(pl.program_id(2) == 0)
    def _init():
        acc_ref[...] = jnp.zeros_like(acc_ref)

    acc_ref[...] += jnp.dot(x_ref[...], w_ref[...],
                            preferred_element_type=jnp.float32)

    @pl.when(pl.program_id(2) == pl.num_programs(2) - 1)
    def _done():
        o_ref[...] = (acc_ref[...] + b_ref[...].astype(jnp.float32)).astype(o_ref.dtype)


def pallas_linear(x, w, bias=None, out_dtype=jnp.float32,
                  tm_target=512, tn_target=512, tk_target=1024):
    """x: (M, K), w: (K, Nout) [bf16 recommended], bias: (Nout,) f32 or None."""
    M, K = x.shape
    _, Nout = w.shape
    tm = _pick_tile(M, tm_target, align=8)
    tn = _pick_tile(Nout, tn_target, align=128)
    tk = _pick_tile(K, tk_target, align=128)
    vmem = _vmem_limit()
    out_shape = jax.ShapeDtypeStruct((M, Nout), out_dtype)

    if tk == K:
        # Single K step: no K grid axis, no accumulator scratch / revisit.
        grid = (M // tm, Nout // tn)
        x_spec = pl.BlockSpec((tm, K), lambda i, j: (i, 0))
        w_spec = pl.BlockSpec((K, tn), lambda i, j: (0, j))
        o_spec = pl.BlockSpec((tm, tn), lambda i, j: (i, j))
        cp = pltpu.CompilerParams(
            dimension_semantics=("parallel", "parallel"), vmem_limit_bytes=vmem)
        if bias is None:
            return pl.pallas_call(
                _matmul_kernel_1k, out_shape=out_shape, grid=grid,
                in_specs=[x_spec, w_spec], out_specs=o_spec,
                compiler_params=cp)(x, w)
        b_spec = pl.BlockSpec((1, tn), lambda i, j: (0, j))
        return pl.pallas_call(
            _matmul_bias_kernel_1k, out_shape=out_shape, grid=grid,
            in_specs=[x_spec, w_spec, b_spec], out_specs=o_spec,
            compiler_params=cp)(x, w, bias.reshape(1, Nout))

    # General K-tiled path (used only when K does not fit a single tile).
    grid = (M // tm, Nout // tn, K // tk)
    x_spec = pl.BlockSpec((tm, tk), lambda i, j, k: (i, k))
    w_spec = pl.BlockSpec((tk, tn), lambda i, j, k: (k, j))
    o_spec = pl.BlockSpec((tm, tn), lambda i, j, k: (i, j))
    cp = pltpu.CompilerParams(
        dimension_semantics=("parallel", "parallel", "arbitrary"),
        vmem_limit_bytes=vmem)
    scratch = [pltpu.VMEM((tm, tn), jnp.float32)]
    if bias is None:
        return pl.pallas_call(
            _matmul_kernel, out_shape=out_shape, grid=grid,
            in_specs=[x_spec, w_spec], out_specs=o_spec,
            scratch_shapes=scratch, compiler_params=cp)(x, w)
    b_spec = pl.BlockSpec((1, tn), lambda i, j, k: (0, j))
    return pl.pallas_call(
        _matmul_bias_kernel, out_shape=out_shape, grid=grid,
        in_specs=[x_spec, w_spec, b_spec], out_specs=o_spec,
        scratch_shapes=scratch, compiler_params=cp)(x, w, bias.reshape(1, Nout))


# --------------------------- fused RoPE + head split (one pass) ---------------------------


def _qk_half_permutation(C, H, hd):
    """qkv-weight column permutation putting each head's even dims first and odd dims
    second for the q and k blocks (v untouched). q.k is invariant under it."""
    within = np.concatenate([np.arange(0, hd, 2), np.arange(1, hd, 2)])
    head_cols = (np.arange(H)[:, None] * hd + within[None, :]).reshape(-1)
    perm = np.concatenate([head_cols, C + head_cols, 2 * C + np.arange(C)])
    return jnp.asarray(perm, dtype=jnp.int32)


def _rope_split_kernel(qkv_ref, cos_ref, sin_ref, q_ref, k_ref, v_ref, *, H, hd, scale):
    # qkv_ref: (tn, 3C) bf16 ; cos/sin: (tn, hd//2) f32 ; q/k/v_ref: (H, tn, hd) bf16
    cos = cos_ref[...]
    sin = sin_ref[...]
    half = hd // 2
    C = H * hd

    def rope(x, s):
        x = x.astype(jnp.float32)
        x1 = x[:, :half]
        x2 = x[:, half:]
        o1 = (x1 * cos - x2 * sin) * s
        o2 = (x2 * cos + x1 * sin) * s
        return jnp.concatenate([o1, o2], axis=-1)

    for h in range(H):  # static unroll over heads (pure VPU work, once per element)
        q_ref[h, :, :] = rope(qkv_ref[:, h * hd:(h + 1) * hd], scale).astype(q_ref.dtype)
        k_ref[h, :, :] = rope(qkv_ref[:, C + h * hd:C + (h + 1) * hd], 1.0).astype(k_ref.dtype)
        v_ref[h, :, :] = qkv_ref[:, 2 * C + h * hd:2 * C + (h + 1) * hd]


def pallas_rope_split(qkv, cos, sin, H, hd, *, scale, tn_target=256):
    """qkv: (B, N, 3C) bf16 (split-half q/k basis) -> RoPE'd+scaled q, RoPE'd k,
    pass-through v, each (B, H, N, hd) bf16.  Replaces the old HBM transpose."""
    B, N, C3 = qkv.shape
    tn = _pick_tile(N, tn_target, align=8)
    out_sds = jax.ShapeDtypeStruct((B, H, N, hd), jnp.bfloat16)
    qkv_spec = pl.BlockSpec((None, tn, C3), lambda b, i: (b, i, 0))
    tab_spec = pl.BlockSpec((tn, hd // 2), lambda b, i: (i, 0))
    out_spec = pl.BlockSpec((None, H, tn, hd), lambda b, i: (b, 0, i, 0))
    return pl.pallas_call(
        functools.partial(_rope_split_kernel, H=H, hd=hd, scale=scale),
        out_shape=(out_sds, out_sds, out_sds),
        grid=(B, N // tn),
        in_specs=[qkv_spec, tab_spec, tab_spec],
        out_specs=(out_spec, out_spec, out_spec),
        compiler_params=pltpu.CompilerParams(
            dimension_semantics=("parallel", "parallel"),
            vmem_limit_bytes=_vmem_limit()),
    )(qkv, cos, sin)


# --------------------------- flash attention (online softmax) ---------------------------


def _flash_attn_kernel(q_ref, k_ref, v_ref, o_ref, m_scr, l_scr, acc_scr):
    # q_ref: (H, tq, hd), k_ref/v_ref: (H, tk, hd), o_ref: (tq, H*hd)
    ki = pl.program_id(2)

    @pl.when(ki == 0)
    def _init():
        m_scr[...] = jnp.full_like(m_scr, -jnp.inf)
        l_scr[...] = jnp.zeros_like(l_scr)
        acc_scr[...] = jnp.zeros_like(acc_scr)

    # scores for all heads at once: (H, tq, tk), f32 accumulation on the MXU
    s = jnp.einsum("hqd,hkd->hqk", q_ref[...], k_ref[...],
                   preferred_element_type=jnp.float32)

    m_prev = m_scr[...]
    m_new = jnp.maximum(m_prev, jnp.max(s, axis=-1, keepdims=True))
    alpha = jnp.exp(m_prev - m_new)
    p = jnp.exp(s - m_new)
    l_scr[...] = alpha * l_scr[...] + jnp.sum(p, axis=-1, keepdims=True)
    acc_scr[...] = alpha * acc_scr[...] + jnp.einsum(
        "hqk,hkd->hqd", p.astype(jnp.bfloat16), v_ref[...],
        preferred_element_type=jnp.float32)
    m_scr[...] = m_new

    @pl.when(ki == pl.num_programs(2) - 1)
    def _done():
        H, tq, hd = acc_scr.shape
        inv_l = pl.reciprocal(l_scr[...], approx=False)  # exact; once per q tile
        for h in range(H):                               # lane-dense (tq, H*hd) write
            o_ref[:, h * hd:(h + 1) * hd] = (acc_scr[h] * inv_l[h]).astype(o_ref.dtype)


def pallas_flash_attention(q, k, v, *, tq_target=256, tk_target=256):
    """q, k, v: (B, H, N, hd) bf16 (q pre-scaled, q/k pre-RoPE'd) -> (B, N, H*hd) bf16.
    No mask / dropout (module defaults)."""
    B, H, N, hd = q.shape
    C = H * hd
    tq = _pick_tile(N, tq_target, align=8)
    tk = _pick_tile(N, tk_target, align=128)

    q_spec = pl.BlockSpec((None, H, tq, hd), lambda b, qi, ki: (b, 0, qi, 0))
    kv_spec = pl.BlockSpec((None, H, tk, hd), lambda b, qi, ki: (b, 0, ki, 0))
    o_spec = pl.BlockSpec((None, tq, C), lambda b, qi, ki: (b, qi, 0))

    return pl.pallas_call(
        _flash_attn_kernel,
        out_shape=jax.ShapeDtypeStruct((B, N, C), jnp.bfloat16),
        grid=(B, N // tq, N // tk),
        in_specs=[q_spec, kv_spec, kv_spec],
        out_specs=o_spec,
        scratch_shapes=[
            pltpu.VMEM((H, tq, 1), jnp.float32),    # running max
            pltpu.VMEM((H, tq, 1), jnp.float32),    # running denominator
            pltpu.VMEM((H, tq, hd), jnp.float32),   # output accumulator
        ],
        compiler_params=pltpu.CompilerParams(
            dimension_semantics=("parallel", "parallel", "arbitrary"),
            vmem_limit_bytes=_vmem_limit()),
    )(q, k, v)


# --------------------------------- forward ---------------------------------


def attention_forward(x, params, num_heads, freqs_cos=None, freqs_sin=None):
    """Mirrors Attention.forward with module defaults (qkv_bias=False, qk_norm=False,
    block_mask=None, attn_mask=None, eval mode / no dropout)."""
    # TODO(synk): attn_mask / flex_attention block_mask, dropout > 0 and qk_norm=True
    # (per-head LayerNorm) are not implemented; module defaults only.
    B, N, C = x.shape
    H = num_heads
    hd = C // H

    # qkv projection (qkv_bias=False).  Weight columns for q/k permuted into the
    # split-half RoPE basis; q.k dot products are invariant under the shared permutation.
    perm = _qk_half_permutation(C, H, hd)
    qkv_w = params["qkv_w"].astype(jnp.bfloat16)[:, perm]
    x_bf = x.astype(jnp.bfloat16).reshape(B * N, C)
    qkv = pallas_linear(x_bf, qkv_w, bias=None, out_dtype=jnp.bfloat16)   # (B*N, 3C)
    qkv = qkv.reshape(B, N, 3 * C)                                        # free reshape

    # RoPE tables: split-half convention needs only the raw (N, hd//2) tables.
    if freqs_cos is None:
        cos = jnp.ones((N, hd // 2), jnp.float32)
        sin = jnp.zeros((N, hd // 2), jnp.float32)
    else:
        cos = freqs_cos.astype(jnp.float32)
        sin = freqs_sin.astype(jnp.float32)

    # One-pass fused RoPE (q & k rotated exactly once) + softmax-scale fold into q
    # + head split into (B, H, N, hd).
    q, k, v = pallas_rope_split(qkv, cos, sin, H, hd, scale=1.0 / math.sqrt(hd))

    # Flash attention (online softmax), lane-dense (B, N, C) output.
    o = pallas_flash_attention(q, k, v)                                   # (B, N, C) bf16

    # Output projection: plain (M, C) x (C, C) matmul, full-C contraction per grid step.
    out = pallas_linear(o.reshape(B * N, C), params["proj_w"].astype(jnp.bfloat16),
                        bias=params["proj_b"].astype(jnp.float32),
                        out_dtype=jnp.float32)                            # (B*N, C)
    return out.reshape(B, N, C)


# ----------------------------- reference (pure JAX, f32) --------------------------


def apply_rotary_emb_ref(xq, xk, freqs_cos, freqs_sin):
    def rot(x):
        xr = x[..., 0::2]
        xi = x[..., 1::2]
        c = freqs_cos[None, None]
        s = freqs_sin[None, None]
        out_r = xr * c - xi * s
        out_i = xr * s + xi * c
        return jnp.stack([out_r, out_i], axis=-1).reshape(x.shape)
    return rot(xq), rot(xk)


def attention_forward_ref(x, params, num_heads, freqs_cos=None, freqs_sin=None):
    B, N, C = x.shape
    hd = C // num_heads
    qkv = x.reshape(B * N, C) @ params["qkv_w"]
    qkv = qkv.reshape(B, N, 3, num_heads, hd).transpose(2, 0, 3, 1, 4)
    q, k, v = qkv[0], qkv[1], qkv[2]
    if freqs_cos is not None:
        q, k = apply_rotary_emb_ref(q, k, freqs_cos, freqs_sin)
    scale = 1.0 / np.sqrt(hd)
    s = jnp.einsum("bhqd,bhkd->bhqk", q, k) * scale
    p = jax.nn.softmax(s, axis=-1)
    o = jnp.einsum("bhqk,bhkd->bhqd", p, v)
    o = o.transpose(0, 2, 1, 3).reshape(B * N, C)
    return (o @ params["proj_w"] + params["proj_b"]).reshape(B, N, C)


# --------------------------------- main --------------------------------------


if __name__ == "__main__":
    B, N, C = 2, 8, 32
    num_heads = 4
    head_dim = C // num_heads

    key = jax.random.PRNGKey(0)
    k_x, k_qkv, k_proj, k_pb = jax.random.split(key, 4)

    x = jax.random.normal(k_x, (B, N, C), dtype=jnp.float32)

    params = {
        "qkv_w": jax.random.normal(k_qkv, (C, 3 * C), dtype=jnp.float32) * (1.0 / np.sqrt(C)),
        "proj_w": jax.random.normal(k_proj, (C, C), dtype=jnp.float32) * (1.0 / np.sqrt(C)),
        "proj_b": jax.random.normal(k_pb, (C,), dtype=jnp.float32) * 0.01,
    }

    # RoPE tables, shape (N, head_dim // 2), interleaved-pair convention (as in the module).
    inv_freq = 1.0 / (10000.0 ** (np.arange(0, head_dim, 2, dtype=np.float32) / head_dim))
    t = np.arange(N, dtype=np.float32)
    freqs = np.outer(t, inv_freq)
    freqs_cos = jnp.asarray(np.cos(freqs), dtype=jnp.float32)
    freqs_sin = jnp.asarray(np.sin(freqs), dtype=jnp.float32)

    out = attention_forward(x, params, num_heads, freqs_cos, freqs_sin)
    out = jax.block_until_ready(out)

    ref = attention_forward_ref(x, params, num_heads, freqs_cos, freqs_sin)
    # bf16 MXU inputs -> loosened tolerance vs f32 reference.
    np.testing.assert_allclose(np.asarray(out), np.asarray(ref), rtol=5e-2, atol=5e-2)

    print("KERNEL_OK")
</pallas_src>

<mosaic_0001>
module attributes {stable_mosaic.version = 11 : i64} {
  func.func @_matmul_kernel_1k(%arg0: i32, %arg1: i32, %arg2: memref<16x32xbf16, #tpu.memory_space<vmem>>, %arg3: memref<32x96xbf16, #tpu.memory_space<vmem>>, %arg4: memref<16x96xbf16, #tpu.memory_space<vmem>>) attributes {dimension_semantics = [#tpu.dimension_semantics<parallel>, #tpu.dimension_semantics<parallel>], iteration_bounds = array<i64: 1, 1>, scalar_prefetch = 0 : i64, scratch_operands = 0 : i64, tpu.core_type = #tpu.core_type<tc>, window_params = [{transform_indices = @transform_0, window_bounds = array<i64: 16, 32>}, {transform_indices = @transform_1, window_bounds = array<i64: 32, 96>}, {transform_indices = @transform_2, window_bounds = array<i64: 16, 96>}]} {
    %c0 = arith.constant 0 : index
    %c0_0 = arith.constant 0 : index
    %0 = vector.load %arg2[%c0, %c0_0] : memref<16x32xbf16, #tpu.memory_space<vmem>>, vector<16x32xbf16>
    %c0_1 = arith.constant 0 : index
    %c0_2 = arith.constant 0 : index
    %1 = vector.load %arg3[%c0_1, %c0_2] : memref<32x96xbf16, #tpu.memory_space<vmem>>, vector<32x96xbf16>
    %cst = arith.constant dense<0.000000e+00> : vector<16x96xf32>
    %2 = tpu.matmul %0, %1, %cst {dimension_numbers = #tpu.dot_dimension_numbers<[1], [0], [0], [1], [0, 0, 1, 1], [], []>} : vector<16x32xbf16>, vector<32x96xbf16>, vector<16x96xf32> -> vector<16x96xf32>
    %3 = arith.truncf %2 : vector<16x96xf32> to vector<16x96xbf16>
    %c0_3 = arith.constant 0 : index
    %c0_4 = arith.constant 0 : index
    %4 = vector.load %arg4[%c0_3, %c0_4] : memref<16x96xbf16, #tpu.memory_space<vmem>>, vector<16x96xbf16>
    tpu.vector_store %arg4[%c0_3, %c0_4], %3 {strides = array<i32>} : memref<16x96xbf16, #tpu.memory_space<vmem>>, vector<16x96xbf16>,
    return
  }
  func.func @transform_0(%arg0: i32, %arg1: i32) -> (i32, i32) {
    %c0_i32 = arith.constant 0 : i32
    %c0_i32_0 = arith.constant 0 : i32
    return %arg0, %c0_i32 : i32, i32
  }
  func.func @transform_1(%arg0: i32, %arg1: i32) -> (i32, i32) {
    %c0_i32 = arith.constant 0 : i32
    %c0_i32_0 = arith.constant 0 : i32
    return %c0_i32, %arg1 : i32, i32
  }
  func.func @transform_2(%arg0: i32, %arg1: i32) -> (i32, i32) {
    %c0_i32 = arith.constant 0 : i32
    return %arg0, %arg1 : i32, i32
  }
}

</mosaic_0001>

<bundles_post_ra>
// kernel: tpu_custom_call.1
= control target key start
LH: loop header
LB: loop body
LE: loop exit
PB: predicated region body
PF: predicated region fallthrough
CT: control target
= control target key end

     0   :  { %7 = vsyncpa [#allocation3], 0  ;;  %s306_s0 = inlined_call_operand.hbm [shape: bf16[16,32], index: 0, kind: input, shape index: {}]   ;;  %s307_s1 = inlined_call_operand.hbm [shape: bf16[32,96], index: 1, kind: input, shape index: {}]   ;;  %s308_s2 = inlined_call_operand.hbm [shape: bf16[16,96], index: 2, kind: output, shape index: {}]  }
   0x1   :  { %8 = vsyncpa [#allocation6], 0 }
   0x2   :  { %9 = vsyncpa [#allocation4], 0  ;;  %s239_s9 = smov [#allocation2]   ;;  %s167_s13 = scalar_lea.hbm %s306_s0, 128 }
   0x3   :  { %s15_s10 = sshll.u32 %s239_s9, 4  ;;  %p168_p0 = scmp.ne.s32.totalorder %s306_s0, %s167_s13  ;;  %s16_s10 = int_to_ptr.vmem [resolvable:$true] %s15_s10 }
   0x4   :  { %p171_p1 = scmp.lt.u32.totalorder %s167_s13, %s306_s0 }
   0x6   :  { %p173_p2 = pnand %p171_p1, %p168_p0 }
   0x8   :  { %176 = shalt.err (!%p173_p2)
}
   0x9   :  { %s177_s18 = scalar_lea.vmem %s16_s10, 128  ;;  %p182_p4 = scmp.lt.s32.totalorder %s16_s10, %s16_s10 }
   0xa   :  { %p178_p3 = scmp.ne.s32.totalorder %s16_s10, %s177_s18  ;;  %p183_p5 = scmp.lt.s32.totalorder %s177_s18, %s177_s18 }
   0xc   :  { %p184_p6 = por %p183_p5, %p182_p4 }
   0xe   :  { %p185_p7 = pnand %p184_p6, %p178_p3 }
  0x10   :  { %188 = shalt.err (!%p185_p7)
}
  0x11   :  { %s240_s19 = smov 64   ;;  %s241_s20 = smov 4  }
  0x12   :  { %21 = dma.hbm_to_vmem [thread:$0]  %s306_s0, 128, %s16_s10, [#allocation3], %s240_s19, %s240_s19, %s241_s20  }
  0x13   :  { %s242_s23 = smov [#allocation5]   ;;  %s189_s27 = scalar_lea.hbm %s307_s1, 256 }
  0x14   :  { %s27_s24 = sshll.u32 %s242_s23, 4  ;;  %p190_p8 = scmp.ne.s32.totalorder %s307_s1, %s189_s27  ;;  %s28_s24 = int_to_ptr.vmem [resolvable:$true] %s27_s24 }
  0x15   :  { %p193_p9 = scmp.lt.u32.totalorder %s189_s27, %s307_s1 }
  0x17   :  { %p195_p10 = pnand %p193_p9, %p190_p8 }
  0x19   :  { %198 = shalt.err (!%p195_p10)
}
  0x1a   :  { %s199_s4 = scalar_lea.vmem %s28_s24, 256  ;;  %p204_p12 = scmp.lt.s32.totalorder %s28_s24, %s28_s24 }
  0x1b   :  { %p200_p11 = scmp.ne.s32.totalorder %s28_s24, %s199_s4  ;;  %p205_p13 = scmp.lt.s32.totalorder %s199_s4, %s199_s4 }
  0x1d   :  { %p206_p0 = por %p205_p13, %p204_p12 }
  0x1f   :  { %p207_p1 = pnand %p206_p0, %p200_p11 }
  0x21   :  { %210 = shalt.err (!%p207_p1)
}
  0x22   :  { %33 = dma.hbm_to_vmem [thread:$0]  %s307_s1, 256, %s28_s24, [#allocation6], %s240_s19, %s240_s19, %s241_s20  }
  0x23   :  { %233 = dma.done.wait [#allocation3], 128  }
  0x24   :  { %234 = vsyncadd [#allocation3], 4294967168 }
  0x25   :  { %235 = dma.done.wait [#allocation6], 256  }
  0x26   :  { %236 = vsyncadd [#allocation6], 4294967040  ;;  %v243_v0 = vmov 0.0   ;;  %vm244_vm0 = vmmov 0   ;;  %v164_v1 = vld [vmem:[#allocation5] sm:$0xff]   ;;  %v165_v2 = vld [vmem:[#allocation5 + $0x8] sm:$0xff]  }
  0x27   :  { %149 = vmatprep.subr.bf16.mxu0 %v243_v0  ;;  %153 = vmatprep.mubr.msk.bf16.mxu0 %vm244_vm0, %v243_v0  ;;  %v166_v3 = vld [vmem:[#allocation2] sm:$0xff]   ;;  %vm64_vm1 = vcmask 261120   ;;  %vm117_vm2 = vcmask 781312   ;;  %s245_s6 = smov [#allocation7]  }
  0x28   :  { %150 = vmatpush3.bf16.msra.mxu0 %v164_v1  ;;  %s125_s1 = sshll.u32 %s245_s6, 4  ;;  %s126_s1 = int_to_ptr.vmem [resolvable:$true] %s125_s1 }
  0x29   :  { %151 = vmatprep.subr.bf16.mxu0 %v243_v0  ;;  %s211_s7 = scalar_lea.vmem %s126_s1, 128  ;;  %p216_p3 = scmp.lt.s32.totalorder %s126_s1, %s126_s1 }
  0x2a   :  { %p212_p2 = scmp.ne.s32.totalorder %s126_s1, %s211_s7  ;;  %p217_p4 = scmp.lt.s32.totalorder %s211_s7, %s211_s7 }
  0x2c   :  { %152 = vmatpush3.bf16.msra.mxu0 %v165_v2  ;;  %p218_p5 = por %p217_p4, %p216_p3 }
  0x2e   :  { %p219_p6 = pnand %p218_p5, %p212_p2 }
  0x2f   :  { %154 = vmatmul.mubr.msk.bf16.vlgmr.msra.gmra.mrb[0].mxu0 %vm64_vm1, %v166_v3 }
 0x102   :  { %v102_v4 = vpop.f32.mrb[0].mxu0 }
 0x103   :  { %v144_v5 = vpack.c.bf16 %v102_v4, %v102_v4  ;;  %v155_v6 = vpop.f32.mrb[1].mxu0 }
 0x104   :  { %v105_v7 = vpop.f32.mrb[2].mxu0 }
 0x105   :  { %v145_v8 = vpack.c.bf16 %v105_v7, %v105_v7  ;;  %v156_v9 = vpop.f32.mrb[3].mxu0  ;;  %118 = vst.msk [vmem:[#allocation7] sm:$0xf] %vm117_vm2, %v144_v5 }
 0x107   :  { %119 = vst.msk [vmem:[#allocation7 + $0x4] sm:$0xf] %vm117_vm2, %v145_v8 }
 0x108   :  { %222 = shalt.err (!%p219_p6)
}
 0x109   :  { %s223_s10 = scalar_lea.hbm %s308_s2, 128 }
 0x10a   :  { %p224_p7 = scmp.ne.s32.totalorder %s308_s2, %s223_s10  ;;  %p227_p8 = scmp.lt.u32.totalorder %s223_s10, %s308_s2 }
 0x10c   :  { %p229_p9 = pnand %p227_p8, %p224_p7 }
 0x10e   :  { %232 = shalt.err (!%p229_p9)
}
 0x10f   :  { %131 = dma.vmem_to_hbm [thread:$0]  %s126_s1, 128, %s308_s2, [#allocation4], %s240_s19, %s240_s19, %s241_s20  }
 0x110   :  { %237 = dma.done.wait [#allocation4], 128  }
 0x111   :  { %238 = vsyncadd [#allocation4], 4294967168 }
 0x112   :  { %135 = vsyncpa [#allocation3], 1 }
 0x113   :  { %136 = vsyncpa [#allocation6], 1 }
 0x114   :  { %137 = vsyncpa [#allocation4], 1 }

</bundles_post_ra>
